<compile_context>
chip_gen: v7x
topology: tpu7x:2x2x1
jax: 0.10.0
libtpu: 0.0.40
codegen_flags: <defaults>
</compile_context>

<pallas_src>
from functools import partial

import jax
import jax.numpy as jnp
from jax import lax
from jax.experimental import pallas as pl
from jax.experimental.pallas import tpu as pltpu

_NT_DIMS = (((1,), (1,)), ((), ()))   # contract trailing dims: a @ b.T


def _sqnet_kernel(x_ref, w1_ref, b1_ref, w2_ref, b2_ref, w34_ref, b34_ref,
                  o_ref, *, n_valid, tn, tiles_per_core, total_cols, act_dtype):
    c = pl.program_id(0)   # core-split axis ("parallel")
    j = pl.program_id(1)   # batch-tile reduction axis ("arbitrary")

    # Per-core output block is resident across the whole reduction axis:
    # zero it once, accumulate every step.
    @pl.when(j == 0)
    def _():
        o_ref[...] = jnp.zeros_like(o_ref)

    x = x_ref[...]                                                    # (TN, 3)

    # Layer 1, feature-major: (16,3) . (TN,3)^T -> (16, TN), lane-dense.
    h1 = lax.dot_general(w1_ref[...], x, _NT_DIMS,
                         preferred_element_type=jnp.float32) + b1_ref[...]
    x1 = jnp.tanh(h1.astype(act_dtype))                               # (16, TN)
    h2 = jnp.dot(w2_ref[...], x1,
                 preferred_element_type=jnp.float32) + b2_ref[...]
    x2 = jnp.tanh(h2.astype(act_dtype))                               # (3, TN)
    # fc3 and fc4 fused into a single affine map (f32 result).
    x4 = jnp.dot(w34_ref[...], x2,
                 preferred_element_type=jnp.float32) + b34_ref[...]   # (3, TN)

    def accumulate(v):
        # Gram: contract over the lane (batch) axis -> (3, 3), accumulate f32.
        o_ref[...] += lax.dot_general(
            v, v, _NT_DIMS, preferred_element_type=jnp.float32)[None]

    tile = c * tiles_per_core + j                    # global (unclamped) tile

    if total_cols > n_valid:
        # Only the edge tile (and any ghost tiles past the batch) pay for the
        # iota/compare/select; interior tiles take the plain path.
        is_edge = (tile + 1) * tn > n_valid

        @pl.when(is_edge)
        def _():
            col = tile * tn + lax.broadcasted_iota(jnp.int32, (1, tn), 1)
            accumulate(jnp.where(col < n_valid, x4, 0.0))

        @pl.when(jnp.logical_not(is_edge))
        def _():
            accumulate(x4)
    else:
        accumulate(x4)


def sqnet_forward(x, params, *, tn=8192, num_cores=2, use_bf16=False):
    """x: (N, 3) float32 (PyTorch row layout). Returns the (3, 3) Gram x4.T @ x4.

    `num_cores=2` uses both TensorCores on v7x (per-core partial Grams summed
    here); on single-TC chips it is a cheap serial outer loop.
    `use_bf16=True` runs the tanh/hidden activations in bf16 (v6e/v7x EUP is
    the bottleneck); Gram accumulation stays f32.
    """
    n = x.shape[0]
    assert n > 0 and x.shape[1] == 3
    x = x.astype(jnp.float32)

    w1, b1 = params["w1"], params["b1"]        # (16, 3), (16, 1)
    w2, b2 = params["w2"], params["b2"]        # (3, 16), (3, 1)
    w3, b3 = params["w3"], params["b3"]        # (3, 3),  (3, 1)
    w4, b4 = params["w4"], params["b4"]        # (3, 3),  (3, 1)

    # Fuse the two trailing affine layers (no nonlinearity between them).
    w34 = w4 @ w3                               # (3, 3)
    b34 = w4 @ b3 + b4                          # (3, 1)

    act_dtype = jnp.bfloat16 if use_bf16 else jnp.float32
    w2c = w2.astype(act_dtype)
    w34c = w34.astype(act_dtype)

    # Tile sizing: no padding/copy of x.  A single full-batch block if it
    # fits, otherwise sublane-aligned tiles with a masked ragged last tile.
    if n <= tn:
        tn = n
    else:
        tn = max(8, (tn // 8) * 8)

    n_tiles = pl.cdiv(n, tn)
    num_cores = max(1, min(num_cores, n_tiles))
    tiles_per_core = pl.cdiv(n_tiles, num_cores)
    total_cols = num_cores * tiles_per_core * tn

    kernel = partial(_sqnet_kernel, n_valid=n, tn=tn,
                     tiles_per_core=tiles_per_core, total_cols=total_cols,
                     act_dtype=act_dtype)

    def x_map(c, j):
        # Clamp ghost tiles (past the batch) back in bounds; their columns are
        # fully masked in the kernel so they contribute nothing.
        return (jnp.minimum(c * tiles_per_core + j, n_tiles - 1), 0)

    const = lambda c, j: (0, 0)                 # weights/biases stay resident

    grid_spec = pl.GridSpec(
        grid=(num_cores, tiles_per_core),
        in_specs=[
            pl.BlockSpec((tn, 3), x_map),       # x tile streams, row-major
            pl.BlockSpec(w1.shape, const),
            pl.BlockSpec(b1.shape, const),
            pl.BlockSpec(w2c.shape, const),
            pl.BlockSpec(b2.shape, const),
            pl.BlockSpec(w34c.shape, const),
            pl.BlockSpec(b34.shape, const),
        ],
        out_specs=pl.BlockSpec((1, 3, 3), lambda c, j: (c, 0, 0)),
    )

    partials = pl.pallas_call(
        kernel,
        out_shape=jax.ShapeDtypeStruct((num_cores, 3, 3), jnp.float32),
        grid_spec=grid_spec,
        compiler_params=pltpu.CompilerParams(
            dimension_semantics=("parallel", "arbitrary"),
            vmem_limit_bytes=32 * 1024 * 1024,
        ),
    )(x, w1, b1, w2c, b2, w34c, b34)

    return partials.sum(axis=0)


# ----------------------------------------------------------------------------
# Parameter init (matches the PyTorch module's initialization scheme).
# ----------------------------------------------------------------------------
def _xavier_uniform(key, fan_out, fan_in):
    limit = (6.0 / (fan_in + fan_out)) ** 0.5
    return jax.random.uniform(key, (fan_out, fan_in), jnp.float32,
                              minval=-limit, maxval=limit)


def init_params(key, n_hiddenunits=16):
    ks = jax.random.split(key, 8)

    def linear(kw, kb, fan_in, fan_out):
        w = _xavier_uniform(kw, fan_out, fan_in)          # torch layout (out, in)
        bound = 1.0 / (fan_in ** 0.5)                     # torch default bias init
        b = jax.random.uniform(kb, (fan_out, 1), jnp.float32,
                               minval=-bound, maxval=bound)
        return w, b

    w1, b1 = linear(ks[0], ks[1], 3, n_hiddenunits)
    w2, b2 = linear(ks[2], ks[3], n_hiddenunits, 3)
    w3, b3 = linear(ks[4], ks[5], 3, 3)
    w4, b4 = linear(ks[6], ks[7], 3, 3)
    return {"w1": w1, "b1": b1, "w2": w2, "b2": b2,
            "w3": w3, "b3": b3, "w4": w4, "b4": b4}


def _reference_forward(x, p):
    x1 = jnp.tanh(x @ p["w1"].T + p["b1"].T)
    x2 = jnp.tanh(x1 @ p["w2"].T + p["b2"].T)
    x3 = x2 @ p["w3"].T + p["b3"].T
    x4 = x3 @ p["w4"].T + p["b4"].T
    return x4.T @ x4


# TODO(synk): the module's jacobian()/hessian() helpers are autodiff utilities,
# not forward compute; use jax.jacobian / jax.hessian on sqnet_forward instead.

if __name__ == "__main__":
    key = jax.random.PRNGKey(0)
    k_params, k_x = jax.random.split(key)
    params = init_params(k_params, n_hiddenunits=16)

    N = 300
    x = jax.random.normal(k_x, (N, 3), jnp.float32)
    ref = _reference_forward(x, params)

    # Path 1: multi-tile grid with ragged last tile, ghost tile, and the
    # 2-way core split (small TN purely to exercise the masking/accumulation).
    out_tiled = jax.block_until_ready(sqnet_forward(x, params, tn=128))
    assert out_tiled.shape == (3, 3)
    assert jnp.allclose(out_tiled, ref, atol=1e-3, rtol=1e-4), (out_tiled, ref)

    # Path 2: default large-tile config (here N < TN -> single full block).
    out_default = jax.block_until_ready(sqnet_forward(x, params))
    assert jnp.allclose(out_default, ref, atol=1e-3, rtol=1e-4), (out_default, ref)

    print("KERNEL_OK")
</pallas_src>

<mosaic_0001>
module attributes {stable_mosaic.version = 11 : i64} {
  func.func @_sqnet_kernel(%arg0: i32, %arg1: i32, %arg2: memref<128x3xf32, #tpu.memory_space<vmem>>, %arg3: memref<16x3xf32, #tpu.memory_space<vmem>>, %arg4: memref<16x1xf32, #tpu.memory_space<vmem>>, %arg5: memref<3x16xf32, #tpu.memory_space<vmem>>, %arg6: memref<3x1xf32, #tpu.memory_space<vmem>>, %arg7: memref<3x3xf32, #tpu.memory_space<vmem>>, %arg8: memref<3x1xf32, #tpu.memory_space<vmem>>, %arg9: memref<1x3x3xf32, #tpu.memory_space<vmem>>) attributes {dimension_semantics = [#tpu.dimension_semantics<parallel>, #tpu.dimension_semantics<arbitrary>], iteration_bounds = array<i64: 2, 2>, scalar_prefetch = 0 : i64, scratch_operands = 0 : i64, tpu.core_type = #tpu.core_type<tc>, window_params = [{transform_indices = @transform_0, window_bounds = array<i64: 128, 3>}, {pipeline_mode = #tpu.pipeline_mode<synchronous>, transform_indices = @transform_1, window_bounds = array<i64: 16, 3>}, {pipeline_mode = #tpu.pipeline_mode<synchronous>, transform_indices = @transform_2, window_bounds = array<i64: 16, 1>}, {pipeline_mode = #tpu.pipeline_mode<synchronous>, transform_indices = @transform_3, window_bounds = array<i64: 3, 16>}, {pipeline_mode = #tpu.pipeline_mode<synchronous>, transform_indices = @transform_4, window_bounds = array<i64: 3, 1>}, {pipeline_mode = #tpu.pipeline_mode<synchronous>, transform_indices = @transform_5, window_bounds = array<i64: 3, 3>}, {pipeline_mode = #tpu.pipeline_mode<synchronous>, transform_indices = @transform_6, window_bounds = array<i64: 3, 1>}, {transform_indices = @transform_7, window_bounds = array<i64: 1, 3, 3>}]} {
    %c0_i32 = arith.constant 0 : i32
    %0 = arith.cmpi eq, %arg1, %c0_i32 : i32
    %1 = arith.extui %0 : i1 to i32
    %c0_i32_0 = arith.constant 0 : i32
    %2 = arith.cmpi ne, %1, %c0_i32_0 : i32
    scf.if %2 {
      %cst_18 = arith.constant 0.000000e+00 : f32
      %31 = vector.broadcast %cst_18 : f32 to vector<1x3x3xf32>
      %c0_19 = arith.constant 0 : index
      %c0_20 = arith.constant 0 : index
      %c0_21 = arith.constant 0 : index
      %32 = vector.load %arg9[%c0_19, %c0_20, %c0_21] : memref<1x3x3xf32, #tpu.memory_space<vmem>>, vector<1x3x3xf32>
      tpu.vector_store %arg9[%c0_19, %c0_20, %c0_21], %31 {strides = array<i32>} : memref<1x3x3xf32, #tpu.memory_space<vmem>>, vector<1x3x3xf32>,
    } else {
    }
    %c0 = arith.constant 0 : index
    %c0_1 = arith.constant 0 : index
    %3 = vector.load %arg2[%c0, %c0_1] : memref<128x3xf32, #tpu.memory_space<vmem>>, vector<128x3xf32>
    %c0_2 = arith.constant 0 : index
    %c0_3 = arith.constant 0 : index
    %4 = vector.load %arg3[%c0_2, %c0_3] : memref<16x3xf32, #tpu.memory_space<vmem>>, vector<16x3xf32>
    %cst = arith.constant dense<0.000000e+00> : vector<16x128xf32>
    %5 = tpu.matmul %4, %3, %cst {dimension_numbers = #tpu.dot_dimension_numbers<[1], [1], [0], [0], [0, 0, 1, 0], [], []>} : vector<16x3xf32>, vector<128x3xf32>, vector<16x128xf32> -> vector<16x128xf32>
    %c0_4 = arith.constant 0 : index
    %c0_5 = arith.constant 0 : index
    %6 = vector.load %arg4[%c0_4, %c0_5] : memref<16x1xf32, #tpu.memory_space<vmem>>, vector<16x1xf32>
    %7 = vector.broadcast %6 : vector<16x1xf32> to vector<16x128xf32>
    %8 = arith.addf %5, %7 : vector<16x128xf32>
    %9 = math.tanh %8 : vector<16x128xf32>
    %c0_6 = arith.constant 0 : index
    %c0_7 = arith.constant 0 : index
    %10 = vector.load %arg5[%c0_6, %c0_7] : memref<3x16xf32, #tpu.memory_space<vmem>>, vector<3x16xf32>
    %cst_8 = arith.constant dense<0.000000e+00> : vector<3x128xf32>
    %11 = tpu.matmul %10, %9, %cst_8 {dimension_numbers = #tpu.dot_dimension_numbers<[1], [0], [0], [1], [0, 0, 1, 1], [], []>} : vector<3x16xf32>, vector<16x128xf32>, vector<3x128xf32> -> vector<3x128xf32>
    %c0_9 = arith.constant 0 : index
    %c0_10 = arith.constant 0 : index
    %12 = vector.load %arg6[%c0_9, %c0_10] : memref<3x1xf32, #tpu.memory_space<vmem>>, vector<3x1xf32>
    %13 = vector.broadcast %12 : vector<3x1xf32> to vector<3x128xf32>
    %14 = arith.addf %11, %13 : vector<3x128xf32>
    %15 = math.tanh %14 : vector<3x128xf32>
    %c0_11 = arith.constant 0 : index
    %c0_12 = arith.constant 0 : index
    %16 = vector.load %arg7[%c0_11, %c0_12] : memref<3x3xf32, #tpu.memory_space<vmem>>, vector<3x3xf32>
    %cst_13 = arith.constant dense<0.000000e+00> : vector<3x128xf32>
    %17 = tpu.matmul %16, %15, %cst_13 {dimension_numbers = #tpu.dot_dimension_numbers<[1], [0], [0], [1], [0, 0, 1, 1], [], []>} : vector<3x3xf32>, vector<3x128xf32>, vector<3x128xf32> -> vector<3x128xf32>
    %c0_14 = arith.constant 0 : index
    %c0_15 = arith.constant 0 : index
    %18 = vector.load %arg8[%c0_14, %c0_15] : memref<3x1xf32, #tpu.memory_space<vmem>>, vector<3x1xf32>
    %19 = vector.broadcast %18 : vector<3x1xf32> to vector<3x128xf32>
    %20 = arith.addf %17, %19 : vector<3x128xf32>
    %c2_i32 = arith.constant 2 : i32
    %21 = arith.muli %arg0, %c2_i32 : i32
    %22 = arith.addi %21, %arg1 : i32
    %c1_i32 = arith.constant 1 : i32
    %23 = arith.addi %22, %c1_i32 : i32
    %c128_i32 = arith.constant 128 : i32
    %24 = arith.muli %23, %c128_i32 : i32
    %c300_i32 = arith.constant 300 : i32
    %25 = arith.cmpi sgt, %24, %c300_i32 : i32
    %26 = arith.extui %25 : i1 to i32
    %c0_i32_16 = arith.constant 0 : i32
    %27 = arith.cmpi ne, %26, %c0_i32_16 : i32
    scf.if %27 {
      %c128_i32_18 = arith.constant 128 : i32
      %31 = arith.muli %22, %c128_i32_18 : i32
      %32 = tpu.iota {dimensions = array<i32: 1>} : vector<1x128xi32>
      %33 = vector.broadcast %31 : i32 to vector<1x128xi32>
      %34 = arith.addi %33, %32 : vector<1x128xi32>
      %c300_i32_19 = arith.constant 300 : i32
      %35 = vector.broadcast %c300_i32_19 : i32 to vector<1x128xi32>
      %36 = arith.cmpi slt, %34, %35 : vector<1x128xi32>
      %cst_20 = arith.constant 0.000000e+00 : f32
      %37 = vector.shape_cast %36 : vector<1x128xi1> to vector<1x128xi1>
      %38 = vector.broadcast %37 : vector<1x128xi1> to vector<3x128xi1>
      %39 = vector.broadcast %cst_20 : f32 to vector<3x128xf32>
      %40 = arith.select %38, %20, %39 : vector<3x128xi1>, vector<3x128xf32>
      %c0_21 = arith.constant 0 : index
      %c0_22 = arith.constant 0 : index
      %c0_23 = arith.constant 0 : index
      %41 = vector.load %arg9[%c0_21, %c0_22, %c0_23] : memref<1x3x3xf32, #tpu.memory_space<vmem>>, vector<1x3x3xf32>
      %cst_24 = arith.constant dense<0.000000e+00> : vector<3x3xf32>
      %42 = tpu.matmul %40, %40, %cst_24 {dimension_numbers = #tpu.dot_dimension_numbers<[1], [1], [0], [0], [0, 0, 1, 0], [], []>} : vector<3x128xf32>, vector<3x128xf32>, vector<3x3xf32> -> vector<3x3xf32>
      %43 = vector.shape_cast %42 : vector<3x3xf32> to vector<1x3x3xf32>
      %44 = arith.addf %41, %43 : vector<1x3x3xf32>
      %c0_25 = arith.constant 0 : index
      %c0_26 = arith.constant 0 : index
      %c0_27 = arith.constant 0 : index
      %45 = vector.load %arg9[%c0_25, %c0_26, %c0_27] : memref<1x3x3xf32, #tpu.memory_space<vmem>>, vector<1x3x3xf32>
      tpu.vector_store %arg9[%c0_25, %c0_26, %c0_27], %44 {strides = array<i32>} : memref<1x3x3xf32, #tpu.memory_space<vmem>>, vector<1x3x3xf32>,
    } else {
    }
    %true = arith.constant true
    %28 = arith.xori %25, %true : i1
    %29 = arith.extui %28 : i1 to i32
    %c0_i32_17 = arith.constant 0 : i32
    %30 = arith.cmpi ne, %29, %c0_i32_17 : i32
    scf.if %30 {
      %c0_18 = arith.constant 0 : index
      %c0_19 = arith.constant 0 : index
      %c0_20 = arith.constant 0 : index
      %31 = vector.load %arg9[%c0_18, %c0_19, %c0_20] : memref<1x3x3xf32, #tpu.memory_space<vmem>>, vector<1x3x3xf32>
      %cst_21 = arith.constant dense<0.000000e+00> : vector<3x3xf32>
      %32 = tpu.matmul %20, %20, %cst_21 {dimension_numbers = #tpu.dot_dimension_numbers<[1], [1], [0], [0], [0, 0, 1, 0], [], []>} : vector<3x128xf32>, vector<3x128xf32>, vector<3x3xf32> -> vector<3x3xf32>
      %33 = vector.shape_cast %32 : vector<3x3xf32> to vector<1x3x3xf32>
      %34 = arith.addf %31, %33 : vector<1x3x3xf32>
      %c0_22 = arith.constant 0 : index
      %c0_23 = arith.constant 0 : index
      %c0_24 = arith.constant 0 : index
      %35 = vector.load %arg9[%c0_22, %c0_23, %c0_24] : memref<1x3x3xf32, #tpu.memory_space<vmem>>, vector<1x3x3xf32>
      tpu.vector_store %arg9[%c0_22, %c0_23, %c0_24], %34 {strides = array<i32>} : memref<1x3x3xf32, #tpu.memory_space<vmem>>, vector<1x3x3xf32>,
    } else {
    }
    return
  }
  func.func @transform_0(%arg0: i32, %arg1: i32) -> (i32, i32) {
    %c2_i32 = arith.constant 2 : i32
    %0 = arith.muli %arg0, %c2_i32 : i32
    %1 = arith.addi %0, %arg1 : i32
    %c2_i32_0 = arith.constant 2 : i32
    %2 = arith.minsi %1, %c2_i32_0 : i32
    %c0_i32 = arith.constant 0 : i32
    %c0_i32_1 = arith.constant 0 : i32
    return %2, %c0_i32 : i32, i32
  }
  func.func @transform_1(%arg0: i32, %arg1: i32) -> (i32, i32) {
    %c0_i32 = arith.constant 0 : i32
    %c0_i32_0 = arith.constant 0 : i32
    %c0_i32_1 = arith.constant 0 : i32
    return %c0_i32, %c0_i32_0 : i32, i32
  }
  func.func @transform_2(%arg0: i32, %arg1: i32) -> (i32, i32) {
    %c0_i32 = arith.constant 0 : i32
    %c0_i32_0 = arith.constant 0 : i32
    %c0_i32_1 = arith.constant 0 : i32
    return %c0_i32, %c0_i32_0 : i32, i32
  }
  func.func @transform_3(%arg0: i32, %arg1: i32) -> (i32, i32) {
    %c0_i32 = arith.constant 0 : i32
    %c0_i32_0 = arith.constant 0 : i32
    %c0_i32_1 = arith.constant 0 : i32
    return %c0_i32, %c0_i32_0 : i32, i32
  }
  func.func @transform_4(%arg0: i32, %arg1: i32) -> (i32, i32) {
    %c0_i32 = arith.constant 0 : i32
    %c0_i32_0 = arith.constant 0 : i32
    %c0_i32_1 = arith.constant 0 : i32
    return %c0_i32, %c0_i32_0 : i32, i32
  }
  func.func @transform_5(%arg0: i32, %arg1: i32) -> (i32, i32) {
    %c0_i32 = arith.constant 0 : i32
    %c0_i32_0 = arith.constant 0 : i32
    %c0_i32_1 = arith.constant 0 : i32
    return %c0_i32, %c0_i32_0 : i32, i32
  }
  func.func @transform_6(%arg0: i32, %arg1: i32) -> (i32, i32) {
    %c0_i32 = arith.constant 0 : i32
    %c0_i32_0 = arith.constant 0 : i32
    %c0_i32_1 = arith.constant 0 : i32
    return %c0_i32, %c0_i32_0 : i32, i32
  }
  func.func @transform_7(%arg0: i32, %arg1: i32) -> (i32, i32, i32) {
    %c0_i32 = arith.constant 0 : i32
    %c0_i32_0 = arith.constant 0 : i32
    %c0_i32_1 = arith.constant 0 : i32
    return %arg0, %c0_i32, %c0_i32_0 : i32, i32, i32
  }
}

</mosaic_0001>

<bundles_post_ra>
// kernel: tpu_custom_call.1
= control target key start
LH: loop header
LB: loop body
LE: loop exit
PB: predicated region body
PF: predicated region fallthrough
CT: control target
= control target key end

     0   :  { %s1231_s24 = smov 0   ;;  %s1233_s25 = smov 0   ;;  %s1383_s0 = inlined_call_operand.vmem [shape: f32[300,3], index: 0, kind: input, shape index: {}]   ;;  %s1384_s1 = inlined_call_operand.vmem [shape: f32[16,3], index: 1, kind: input, shape index: {}]   ;;  %s1385_s2 = inlined_call_operand.vmem [shape: f32[16,1], index: 2, kind: input, shape index: {}]   ;;  %s1386_s3 = inlined_call_operand.vmem [shape: f32[3,16], index: 3, kind: input, shape index: {}]   ;;  %s1387_s4 = inlined_call_operand.vmem [shape: f32[3,1], index: 4, kind: input, shape index: {}]   ;;  %s1388_s5 = inlined_call_operand.vmem [shape: f32[3,3], index: 5, kind: input, shape index: {}]   ;;  %s1389_s6 = inlined_call_operand.vmem [shape: f32[3,1], index: 6, kind: input, shape index: {}]   ;;  %s1390_s7 = inlined_call_operand.vmem [shape: f32[2,3,3], index: 7, kind: output, shape index: {}]  }
   0x1   :  { %s1235_s26 = smov 0   ;;  %s1237_s27 = smov 0  }
   0x2   :  { %s1239_s28 = smov 0  }
   0x3 LB: > { %s26_s29 = sadd.s32 1, %s1172_s26  ;;  %s29_s30 = sadd.s32 1, %s1176_s27  ;;  %s1180_s28 = sphi %s1239_s28, %s17_s28   ;;  %s1176_s27 = sphi %s1237_s27, %s1396_s27   ;;  %s1172_s26 = sphi %s1235_s26, %s1395_s26   ;;  %s1168_s25 = sphi %s1233_s25, %s1394_s25   ;;  %s1164_s24 = sphi %s1231_s24, %s1393_s24  }
   0x4   : > { %p27_p0 = scmp.ge.s32.totalorder %s26_s29, 2  ;;  %p912_p1 = scmp.ge.s32.totalorder %s1180_s28, 1 }
   0x5   : > { %p274_p2 = scmp.lt.s32.totalorder %s1180_s28, 5 }
   0x6   : > { %s1398_s29 = smov (%p27_p0, %s26_s29), 0  ;;  %s1400_s30 = smov (!%p27_p0, %s29_s30), %s1176_s27 }
   0x7   : > { %p275_p3 = pnand %p912_p1, %p274_p2  ;;  %p31_p4 = scmp.ge.s32.totalorder %s1400_s30, 2 }
   0x8   : > { %s913_s8 = sshll.u32 (!%p275_p3), %s1168_s25, 1  ;;  %p335_p5 = scmp.lt.s32.totalorder (!%p275_p3), %s1168_s25, 1 }
   0x9   : > { %s1402_s30 = smov (%p31_p4, %s1400_s30), 0  ;;  %278 = sbr.rel (%p275_p3) target bundleno = 1202 (0x4b2), region = 48 }
   0xa   : > { %s1264_s9 = sadd.s32 (!%p275_p3), %s1164_s24, %s913_s8  ;;  %p917_p8 = scmp.ne.s32.totalorder (!%p275_p3), %s1164_s24, 0 }
   0xb   : > { %p315_p6 = scmp.lt.s32.totalorder (!%p275_p3), %s1264_s9, 2 }
  0x10   : > { %s1404_s25 = smov (!%p335_p5, %s1168_s25), 1  ;;  %vm343_vm0 = vcmask (!%p917_p8), 18432   ;;  %v1182_v0 = vmov (!%p917_p8), 0.0  }
  0x11   : > { %s316_s10 = scalar_select %p315_p6, %s1264_s9, 2 }
  0x12   : > { %s916_s11 = sshll.u32 %s1404_s25, 2  ;;  %342 = sbr.rel (%p917_p8) target bundleno = 25 (0x19), region = 52 }
  0x13   : > { %s914_s12 = sshll.u32 %s316_s10, 4  ;;  %s1271_s15 = scalar_lea.vmem %s1390_s7, %s916_s11 }
  0x14   : > { %p322_p7 = scmp.lt.s32.totalorder %s914_s12, 37  ;;  %344 = vst.msk [vmem:[%s1271_s15] sm:$0x7] (!%p917_p8), %vm343_vm0, %v1182_v0 }
  0x16   : > { %s1406_s12 = smov (!%p322_p7, %s914_s12), 37 }
  0x17   : > { %s915_s16 = sshll.u32 %s1406_s12, 3 }
  0x18   : > { %s1276_s19 = scalar_lea.vmem %s1383_s0, %s915_s16 }
  0x19 PF: > { %v345_v1 = vld [vmem:[%s1276_s19] sm:$0xff]  ;;  %v346_v2 = vld [vmem:[%s1276_s19 + $0x8] sm:$0xff]  ;;  %vm375_vm1 = vcmask 23552   ;;  %v347_v3 = vld [vmem:[%s1276_s19 + $0x10] sm:$0xff]  ;;  %v1183_v7 = vmov 0   ;;  %v1184_v31 = vmov 0.0|0.0  }
  0x1a   : > { %v1034_v4 = vpack.c.bf16 %v346_v2, %v345_v1  ;;  %vm1285_vm2 = vmpackc.low %vm375_vm1, %vm375_vm1  ;;  %v348_v6 = vld [vmem:[%s1276_s19 + $0x18] sm:$0xff]  ;;  %1134 = vset.pattern.permute.xlu0 %v1183_v7  ;;  %1135 = vset.pattern.permute.xlu1 %v1183_v7  ;;  %v361_v9 = vld [vmem:[%s1384_s1] sm:$0xff]  ;;  %vm1185_vm3 = vmmov 0   ;;  %v1186_v32 = vmov 0.0   ;;  %vm514_vm4 = vcmask 130048   ;;  %s948_s20 = sshll.u32 %s1264_s9, 7 }
  0x1b   : > { %v1040_v8 = vpack.c.bf16 %v348_v6, %v347_v3  ;;  %v349_v10 = vld [vmem:[%s1276_s19 + $0x20] sm:$0xff]  ;;  %v350_v11 = vld [vmem:[%s1276_s19 + $0x28] sm:$0xff]  ;;  %1009 = vmatprep.mubr.msk.f32.mxu0 %vm375_vm1, %v361_v9  ;;  %v351_v15 = vld [vmem:[%s1276_s19 + $0x30] sm:$0xff]  ;;  %1082 = vmatprep.subr.bf16.mxu1 %v1184_v31  ;;  %vm599_vm5 = vcmask 1042432   ;;  %s949_s21 = sadd.s32 128, %s948_s20 }
  0x1c   : > { %1036 = vmatprep.subr.msk.bf16.mxu0 %vm1285_vm2, %v1034_v4  ;;  %v363_v12 = vld [vmem:[%s1385_s2] sm:$0xff]  ;;  %v364_v13 = vld [vmem:[%s1385_s2 + $0x8] sm:$0xff]  ;;  %v1046_v14 = vpack.c.bf16 %v350_v11, %v349_v10  ;;  %v352_v16 = vld [vmem:[%s1276_s19 + $0x38] sm:$0xff]  ;;  %1016 = vmatprep.mubr.msk.f32.mxu1 %vm1185_vm3, %v1186_v32  ;;  %p941_p9 = scmp.le.s32.totalorder %s949_s21, 300 }
  0x1d   : > { %1039 = vmatpush3.bf16.xpose.msk.msra.mxu0 %vm1285_vm2, %v1034_v4  ;;  %367 = vperm.xlu0 %1134, %v363_v12   ;;  %v1052_v17 = vpack.c.bf16 %v352_v16, %v351_v15  ;;  %v353_v18 = vld [vmem:[%s1276_s19 + $0x40] sm:$0xff]  ;;  %v354_v19 = vld [vmem:[%s1276_s19 + $0x48] sm:$0xff]  ;;  %v355_v21 = vld [vmem:[%s1276_s19 + $0x50] sm:$0xff]  ;;  %v682_v55 = vlaneseq (!%p941_p9)  ;;  %v1187_v56 = vmov (!%p941_p9), 0.0   ;;  %v684_v57 = vstv (!%p941_p9), %s948_s20 }
  0x1e   : > { %1042 = vmatprep.subr.msk.bf16.mxu0 %vm1285_vm2, %v1040_v8  ;;  %v1058_v20 = vpack.c.bf16 %v354_v19, %v353_v18  ;;  %v356_v22 = vld [vmem:[%s1276_s19 + $0x58] sm:$0xff]  ;;  %v357_v24 = vld [vmem:[%s1276_s19 + $0x60] sm:$0xff]  ;;  %v358_v25 = vld [vmem:[%s1276_s19 + $0x68] sm:$0xff]  ;;  %vm1188_vm6 = vmmov (!%p941_p9), 0   ;;  %vm762_vm8 = vcmask (!%p941_p9), 18432  }
  0x1f   : > { %v1064_v23 = vpack.c.bf16 %v356_v22, %v355_v21  ;;  %v1070_v26 = vpack.c.bf16 %v358_v25, %v357_v24  ;;  %v359_v27 = vld [vmem:[%s1276_s19 + $0x70] sm:$0xff]  ;;  %v360_v28 = vld [vmem:[%s1276_s19 + $0x78] sm:$0xff]  ;;  %v362_v30 = vld [vmem:[%s1384_s1 + $0x8] sm:$0xff]  ;;  %v683_v58 = vand.u32 (!%p941_p9), 127, %v682_v55 }
  0x20   : > { %v1076_v29 = vpack.c.bf16 %v360_v28, %v359_v27  ;;  %v508_v33 = vld [vmem:[%s1387_s4] sm:$0x7] }
  0x21   : > { %372 = vperm.xlu0 %1134, %v364_v13   ;;  %511 = vperm.xlu1 %1135, %v508_v33   ;;  %v590_v34 = vld [vmem:[%s1389_s6] sm:$0x7]  ;;  %v685_v59 = vadd.s32 (!%p941_p9), %v684_v57, %v683_v58 }
  0x22   : > { %v507_v44 = vld [vmem:[%s1386_s3] sm:$0x7] }
  0x23   : > { %v589_v49 = vld [vmem:[%s1388_s5] sm:$0x7]  ;;  %vm686_vm7 = vcmp.lt.s32.totalorder (!%p941_p9), %v685_v59, 300 }
  0x24   : > { %v690_v60 = vld [vmem:[%s1271_s15] sm:$0x7] (!%p941_p9) }
  0x25   : > { %1045 = vmatpush3.bf16.xpose.msk.msra.mxu0 %vm1285_vm2, %v1040_v8  ;;  %593 = vperm.xlu1 %1135, %v590_v34  }
  0x26   : > { %1048 = vmatprep.subr.msk.bf16.mxu0 %vm1285_vm2, %v1046_v14 }
  0x2d   : > { %1051 = vmatpush3.bf16.xpose.msk.msra.mxu0 %vm1285_vm2, %v1046_v14 }
  0x2e   : > { %1054 = vmatprep.subr.msk.bf16.mxu0 %vm1285_vm2, %v1052_v17 }
  0x35   : > { %1057 = vmatpush3.bf16.xpose.msk.msra.mxu0 %vm1285_vm2, %v1052_v17 }
  0x36   : > { %1060 = vmatprep.subr.msk.bf16.mxu0 %vm1285_vm2, %v1058_v20 }
  0x3d   : > { %1063 = vmatpush3.bf16.xpose.msk.msra.mxu0 %vm1285_vm2, %v1058_v20 }
  0x3e   : > { %1066 = vmatprep.subr.msk.bf16.mxu0 %vm1285_vm2, %v1064_v23 }
  0x45   : > { %1069 = vmatpush3.bf16.xpose.msk.msra.mxu0 %vm1285_vm2, %v1064_v23 }
  0x46   : > { %1072 = vmatprep.subr.msk.bf16.mxu0 %vm1285_vm2, %v1070_v26 }
  0x4d   : > { %1075 = vmatpush3.bf16.xpose.msk.msra.mxu0 %vm1285_vm2, %v1070_v26 }
  0x4e   : > { %1078 = vmatprep.subr.msk.bf16.mxu0 %vm1285_vm2, %v1076_v29 }
  0x55   : > { %1081 = vmatpush3.bf16.xpose.msk.msra.mxu0 %vm1285_vm2, %v1076_v29 }
  0x56   : > { %1024 = vmatprep.subr.mxu0 (!%p941_p9), %v1187_v56 }
  0x5c   : > { %1010 = vmatmul.mubr.msk.f32.vlgmr.msra.gmra.mrb[0].mxu0 %vm375_vm1, %v362_v30 }
  0x5d   : > { %1026 = vmatprep.mubr.msk.f32.mxu0 (!%p941_p9), %vm1188_vm6, %v1187_v56 }
  0x9c   : > { %v368_v35 = vpop.permute.xlu0 %367 }
  0xa0   : > { %v373_v36 = vpop.permute.xlu0 %372  ;;  %v512_v45 = vpop.permute.xlu1 %511 }
  0xa4   : > { %v594_v51 = vpop.permute.xlu1 %593 }
 0x12f   : > { %v1011_v37 = vpop.f32.mrb[0].mxu0 }
 0x130   : > { %v502_v38 = vadd.f32 %v1011_v37, %v373_v36  ;;  %v496_v39 = vpop.f32.mrb[1].mxu0 }
 0x131   : > { %v497_v40 = vadd.f32 %v496_v39, %v368_v35 }
 0x132   : > { %1136 = vtanh.f32 %v502_v38 }
 0x133   : > { %1138 = vtanh.f32 %v497_v40 }
 0x13c   : > { %v1137_v41 = vpop.eup %1136 }
 0x13d   : > { %v1139_v42 = vpop.eup %1138 }
 0x13e   : > { %v1083_v43 = vpack.c.bf16 %v1137_v41, %v1139_v42 }
 0x140   : > { %1084 = vmatpush3.bf16.msra.mxu1 %v1083_v43 }
 0x141   : > { %1019 = vmatprep.subr.mxu1 %v1186_v32 }
 0x143   : > { %1017 = vmatmul.mubr.msk.f32.vlgmr.msra.gmra.mrb[0].mxu1 %vm514_vm4, %v507_v44 }
 0x144   : > { %1021 = vmatprep.mubr.msk.f32.mxu1 %vm1185_vm3, %v1186_v32 }
 0x216   : > { %v584_v46 = vpop.f32.mrb[0].mxu1 }
 0x217   : > { %v585_v47 = vadd.f32 %v584_v46, %v512_v45  ;;  %v1018_v48 = vpop.f32.mrb[1].mxu1 }
 0x219   : > { %1140 = vtanh.f32 %v585_v47 }
 0x223   : > { %v1141_v50 = vpop.eup %1140 }
 0x224   : > { %1020 = vmatpush3.msk.msra.mxu1 %vm599_vm5, %v1141_v50 }
 0x225   : > { %1022 = vmatmul.mubr.msk.f32.vlgmr.msra.gmra.mrb[2].mxu1 %vm375_vm1, %v589_v49 }
 0x2f3   : > { %680 = sbr.rel (%p941_p9) target bundleno = 981 (0x3d5), region = 56 }
 0x2f8   : > { %v669_v52 = vpop.f32.mrb[2].mxu1 }
 0x2f9   : > { %v670_v53 = vadd.f32 %v669_v52, %v594_v51  ;;  %v1023_v54 = vpop.f32.mrb[3].mxu1 }
 0x2fb   : > { %1025 = vmatpush3.xpose.msk.msra.mxu0 %vm686_vm7, %v670_v53 }
 0x2fe   : > { %1027 = vmatmul.mubr.msk.f32.vlgmr.msra.gmra.mrb[0].mxu0 %vm686_vm7, %v670_v53 }
 0x3d1   : > { %v757_v61 = vpop.f32.mrb[0].mxu0 }
 0x3d2   : > { %v761_v62 = vadd.f32 %v757_v61, %v690_v60  ;;  %v1028_v63 = vpop.f32.mrb[1].mxu0 }
 0x3d4   : > { %763 = vst.msk [vmem:[%s1271_s15] sm:$0x7] %vm762_vm8, %v761_v62 }
 0x3d5 PF: > { %p945_p10 = scmp.gt.s32.totalorder %s949_s21, 300 }
 0x3d6   : > { %v1189_v0 = vmov (!%p945_p10), 0.0   ;;  %vm1190_vm9 = vmmov (!%p945_p10), 0   ;;  %vm840_vm10 = vcmask (!%p945_p10), 18432  }
 0x3d7   : > { %767 = sbr.rel (%p945_p10) target bundleno = 1202 (0x4b2), region = 60  ;;  %1029 = vmatprep.subr.mxu0 (!%p945_p10), %v1189_v0  ;;  %1031 = vmatprep.mubr.msk.f32.mxu0 (!%p945_p10), %vm1190_vm9, %v1189_v0 }
 0x3d8   : > { %1030 = vmatpush3.xpose.msra.mxu0 (!%p945_p10), %v670_v53 }
 0x3db   : > { %1032 = vmatmul.mubr.f32.vlgmr.msra.gmra.mrb[0].mxu0 (!%p945_p10), %v670_v53  ;;  %v768_v1 = vld [vmem:[%s1271_s15] sm:$0x7] (!%p945_p10) }
 0x4ae   : > { %v835_v2 = vpop.f32.mrb[0].mxu0 }
 0x4af   : > { %v839_v3 = vadd.f32 %v835_v2, %v768_v1  ;;  %v1033_v4 = vpop.f32.mrb[1].mxu0 }
 0x4b1   : > { %841 = vst.msk [vmem:[%s1271_s15] sm:$0x7] %vm840_vm10, %v839_v3 }
 0x4b2 PF: > { %s17_s28 = sadd.s32 1, %s1180_s28   ;;  %s1393_s24 = smov %s1172_s26 }
 0x4b3   : > { %p14_p11 = scmp.ge.s32.totalorder %s17_s28, 6   ;;  %s1394_s25 = smov %s1176_s27 }
 0x4b4   : > { %s1395_s26 = smov %s1398_s29  ;;  %s1396_s27 = smov %s1402_s30 }
 0x4b5   :  { %16 = sbr.rel (!%p14_p11) target bundleno = 3 (0x3), region = 90 }

</bundles_post_ra>
